<compile_context>
chip_gen: v5e
topology: v5e:2x2
jax: 0.10.0
libtpu: 0.0.40
codegen_flags: <defaults>
</compile_context>

<pallas_src>
import functools
import math

import jax
import jax.numpy as jnp
from jax import lax
from jax.experimental import pallas as pl
from jax.experimental.pallas import tpu as pltpu


def _ntxent_lse_kernel(q_ref, k_ref, lse_ref, m_ref, l_ref, *, tr, tc):
    """One (TR, TC) tile of the (pre-scaled) similarity matrix.

    q_ref: (TR, D) query rows (already cosine-normalized and 1/sqrt(tau)-scaled)
    k_ref: (TC, D) key rows (same array, different tiling)
    lse_ref: (TR, 1) per-row logsumexp_{j != i}(sim_ij / tau), written on last col step
    m_ref / l_ref: (TR, 1) online logsumexp state (running max / running sum)
    """
    i = pl.program_id(0)
    j = pl.program_id(1)

    @pl.when(j == 0)
    def _init():
        m_ref[...] = jnp.full_like(m_ref, -1e30)
        l_ref[...] = jnp.zeros_like(l_ref)

    # Similarity tile on the MXU in the native input dtype, f32 accumulation.
    # Inputs carry the 1/sqrt(tau) (and cosine-norm) scaling, so s == sim / tau.
    s = lax.dot_general(q_ref[...], k_ref[...],
                        (((1,), (1,)), ((), ())),
                        preferred_element_type=jnp.float32)       # (TR, TC)

    def online_update(s_blk):
        m_prev = m_ref[...]
        m_new = jnp.maximum(m_prev, jnp.max(s_blk, axis=1, keepdims=True))
        l_ref[...] = (l_ref[...] * jnp.exp(m_prev - m_new)
                      + jnp.sum(jnp.exp(s_blk - m_new), axis=1, keepdims=True))
        m_ref[...] = m_new

    # Only tiles intersecting the main diagonal pay for the per-element self mask.
    row0 = i * tr
    col0 = j * tc
    on_diag = jnp.logical_and(row0 < col0 + tc, col0 < row0 + tr)

    @pl.when(on_diag)
    def _with_self_mask():
        rel = (lax.broadcasted_iota(jnp.int32, (tr, tc), 1)
               - lax.broadcasted_iota(jnp.int32, (tr, tc), 0))
        online_update(jnp.where(rel == (col0 - row0), -1e30, s))

    @pl.when(jnp.logical_not(on_diag))
    def _plain():
        online_update(s)

    @pl.when(j == pl.num_programs(1) - 1)
    def _finalize():
        lse_ref[...] = m_ref[...] + jnp.log(l_ref[...])


def _pick_tile(n, cap):
    """Largest multiple of 8 that divides n and is <= cap; else the full extent."""
    if n <= cap:
        return n
    t = (min(cap, n) // 8) * 8
    while t >= 8:
        if n % t == 0:
            return t
        t -= 8
    # TODO(synk): for large 2N not divisible by 8, pad rows (zero-loss padding)
    # instead of falling back to a single full-extent tile.
    return n


def ntxent_loss(representation, target=None, *, tau=0.5, cosine_similarity=True,
                row_tile_cap=256, col_tile_cap=512):
    """NT-Xent loss. `representation` is (2N, D): two augmented views stacked.

    `target` is accepted for signature parity with the PyTorch module but is unused
    (the reference forward always uses label 0 = the positive column)."""
    del target
    n2, d = representation.shape
    assert n2 % 2 == 0, "representation must have 2N rows (two stacked views)"
    n_half = n2 // 2
    in_dtype = representation.dtype
    itemsize = jnp.dtype(in_dtype).itemsize

    # --- one cheap O(2N*D) pass: cosine norm + 1/sqrt(tau) folded into the rows ---
    x32 = representation.astype(jnp.float32)
    inv_sqrt_tau = float(tau) ** -0.5
    if cosine_similarity:
        scale = lax.rsqrt(jnp.sum(x32 * x32, axis=1, keepdims=True) + 1e-12) * inv_sqrt_tau
    else:
        scale = inv_sqrt_tau
    xs = (x32 * scale).astype(in_dtype)            # MXU sees the native dtype

    # Positive logit per pair (already /tau via the folded scaling); O(N*D), tiny
    # next to the O(N^2*D) kernel, and symmetric across the two views.
    pos = jnp.sum(xs[:n_half].astype(jnp.float32) * xs[n_half:].astype(jnp.float32),
                  axis=1)                          # (N,)

    # --- tile sizes: keep double-buffered input blocks within ~24 MiB ---
    budget_rows = max(16, (24 * 1024 * 1024) // (2 * d * itemsize))
    tr = _pick_tile(n2, min(row_tile_cap, max(8, budget_rows // 3)))
    tc = _pick_tile(n2, min(col_tile_cap, max(8, budget_rows - tr)))
    grid = (n2 // tr, n2 // tc)

    need = (2 * (tr + tc) * d * itemsize    # double-buffered input blocks
            + 4 * tr * tc                   # f32 similarity tile
            + 8 * tr * 4)                   # accumulators / output block
    vmem_limit = int(min(max(need + (4 << 20), 16 << 20), 48 << 20))

    cost = pl.CostEstimate(
        flops=int(2 * n2 * n2 * d + 6 * n2 * n2),
        transcendentals=int(n2 * n2 + n2 * grid[1] + n2),
        bytes_accessed=int(n2 * d * itemsize * (grid[0] + grid[1]) + 8 * n2),
    )

    kernel = functools.partial(_ntxent_lse_kernel, tr=tr, tc=tc)

    lse = pl.pallas_call(
        kernel,
        out_shape=jax.ShapeDtypeStruct((n2, 1), jnp.float32),
        grid_spec=pltpu.PrefetchScalarGridSpec(
            num_scalar_prefetch=0,
            grid=grid,
            in_specs=[
                pl.BlockSpec((tr, d), lambda i, j: (i, 0)),   # query rows
                pl.BlockSpec((tc, d), lambda i, j: (j, 0)),   # key rows
            ],
            out_specs=pl.BlockSpec((tr, 1), lambda i, j: (i, 0)),
            scratch_shapes=[
                pltpu.VMEM((tr, 1), jnp.float32),   # running max m
                pltpu.VMEM((tr, 1), jnp.float32),   # running sum l
            ],
        ),
        compiler_params=pltpu.CompilerParams(
            dimension_semantics=("parallel", "arbitrary"),
            vmem_limit_bytes=vmem_limit,
        ),
        cost_estimate=cost,
    )(xs, xs)

    # loss = mean_i(lse_i - pos_i); pos repeats over the two halves.
    return jnp.sum(lse) / jnp.float32(n2) - jnp.sum(pos) / jnp.float32(n_half)


def _reference(rep, *, tau, cosine_similarity):
    """Pure-JAX reference of the PyTorch NTXentLoss.forward."""
    x = rep.astype(jnp.float32)
    if cosine_similarity:
        x = x * lax.rsqrt(jnp.sum(x * x, axis=1, keepdims=True) + 1e-12)
    sim = (x @ x.T) / tau
    n2 = rep.shape[0]
    n = n2 // 2
    idx = jnp.arange(n2)
    partner = jnp.where(idx < n, idx + n, idx - n)
    pos = sim[idx, partner]
    masked = jnp.where(jnp.eye(n2, dtype=bool), -jnp.inf, sim)
    lse = jax.scipy.special.logsumexp(masked, axis=1)
    return jnp.mean(lse - pos)     # CrossEntropy(sum) / 2N


if __name__ == "__main__":
    key = jax.random.PRNGKey(0)
    k1, _ = jax.random.split(key)

    batch_size = 4          # N -> representation has 2N = 8 rows
    D = 32
    tau = 0.5

    representation = jax.random.normal(k1, (2 * batch_size, D), dtype=jnp.float32)
    dummy_target = jnp.zeros((2 * batch_size,), dtype=jnp.int32)   # unused, as in the reference

    # Cosine-similarity variant (SimCLR default).
    loss_cos = ntxent_loss(representation, dummy_target, tau=tau, cosine_similarity=True)
    loss_cos = jax.block_until_ready(loss_cos)
    ref_cos = _reference(representation, tau=tau, cosine_similarity=True)
    assert jnp.allclose(loss_cos, ref_cos, atol=1e-3, rtol=1e-3), (loss_cos, ref_cos)

    # Dot-similarity variant.
    loss_dot = ntxent_loss(representation, dummy_target, tau=tau, cosine_similarity=False)
    loss_dot = jax.block_until_ready(loss_dot)
    ref_dot = _reference(representation, tau=tau, cosine_similarity=False)
    assert jnp.allclose(loss_dot, ref_dot, atol=1e-3, rtol=1e-3), (loss_dot, ref_dot)

    print("KERNEL_OK")
</pallas_src>

<mosaic_0001>
module attributes {stable_mosaic.version = 11 : i64} {
  func.func @_ntxent_lse_kernel(%arg0: i32, %arg1: i32, %arg2: memref<8x32xf32, #tpu.memory_space<vmem>>, %arg3: memref<8x32xf32, #tpu.memory_space<vmem>>, %arg4: memref<8x1xf32, #tpu.memory_space<vmem>>, %arg5: memref<8x1xf32, #tpu.memory_space<vmem>>, %arg6: memref<8x1xf32, #tpu.memory_space<vmem>>) attributes {dimension_semantics = [#tpu.dimension_semantics<parallel>, #tpu.dimension_semantics<arbitrary>], iteration_bounds = array<i64: 1, 1>, scalar_prefetch = 0 : i64, scratch_operands = 2 : i64, tpu.core_type = #tpu.core_type<tc>, window_params = [{transform_indices = @transform_0, window_bounds = array<i64: 8, 32>}, {transform_indices = @transform_1, window_bounds = array<i64: 8, 32>}, {transform_indices = @transform_2, window_bounds = array<i64: 8, 1>}]} {
    %c0_i32 = arith.constant 0 : i32
    %0 = arith.cmpi eq, %arg1, %c0_i32 : i32
    %1 = arith.extui %0 : i1 to i32
    %c0_i32_0 = arith.constant 0 : i32
    %2 = arith.cmpi ne, %1, %c0_i32_0 : i32
    scf.if %2 {
      %cst_11 = arith.constant -1.000000e+30 : f32
      %21 = vector.broadcast %cst_11 : f32 to vector<8x1xf32>
      %c0_12 = arith.constant 0 : index
      %c0_13 = arith.constant 0 : index
      %22 = vector.load %arg5[%c0_12, %c0_13] : memref<8x1xf32, #tpu.memory_space<vmem>>, vector<8x1xf32>
      tpu.vector_store %arg5[%c0_12, %c0_13], %21 {strides = array<i32>} : memref<8x1xf32, #tpu.memory_space<vmem>>, vector<8x1xf32>,
      %cst_14 = arith.constant 0.000000e+00 : f32
      %23 = vector.broadcast %cst_14 : f32 to vector<8x1xf32>
      %c0_15 = arith.constant 0 : index
      %c0_16 = arith.constant 0 : index
      %24 = vector.load %arg6[%c0_15, %c0_16] : memref<8x1xf32, #tpu.memory_space<vmem>>, vector<8x1xf32>
      tpu.vector_store %arg6[%c0_15, %c0_16], %23 {strides = array<i32>} : memref<8x1xf32, #tpu.memory_space<vmem>>, vector<8x1xf32>,
    } else {
    }
    %c0 = arith.constant 0 : index
    %c0_1 = arith.constant 0 : index
    %3 = vector.load %arg2[%c0, %c0_1] : memref<8x32xf32, #tpu.memory_space<vmem>>, vector<8x32xf32>
    %c0_2 = arith.constant 0 : index
    %c0_3 = arith.constant 0 : index
    %4 = vector.load %arg3[%c0_2, %c0_3] : memref<8x32xf32, #tpu.memory_space<vmem>>, vector<8x32xf32>
    %cst = arith.constant dense<0.000000e+00> : vector<8x8xf32>
    %5 = tpu.matmul %3, %4, %cst {dimension_numbers = #tpu.dot_dimension_numbers<[1], [1], [0], [0], [0, 0, 1, 0], [], []>} : vector<8x32xf32>, vector<8x32xf32>, vector<8x8xf32> -> vector<8x8xf32>
    %c8_i32 = arith.constant 8 : i32
    %6 = arith.muli %arg0, %c8_i32 : i32
    %c8_i32_4 = arith.constant 8 : i32
    %7 = arith.muli %arg1, %c8_i32_4 : i32
    %c8_i32_5 = arith.constant 8 : i32
    %8 = arith.addi %7, %c8_i32_5 : i32
    %9 = arith.cmpi slt, %6, %8 : i32
    %c8_i32_6 = arith.constant 8 : i32
    %10 = arith.addi %6, %c8_i32_6 : i32
    %11 = arith.cmpi slt, %7, %10 : i32
    %12 = arith.andi %9, %11 : i1
    %13 = arith.extui %12 : i1 to i32
    %c0_i32_7 = arith.constant 0 : i32
    %14 = arith.cmpi ne, %13, %c0_i32_7 : i32
    scf.if %14 {
      %21 = tpu.iota {dimensions = array<i32: 1>} : vector<8x8xi32>
      %22 = tpu.iota {dimensions = array<i32: 0>} : vector<8x8xi32>
      %23 = arith.subi %21, %22 : vector<8x8xi32>
      %24 = arith.subi %7, %6 : i32
      %25 = vector.broadcast %24 : i32 to vector<8x8xi32>
      %26 = arith.cmpi eq, %23, %25 : vector<8x8xi32>
      %cst_11 = arith.constant -1.000000e+30 : f32
      %27 = vector.broadcast %cst_11 : f32 to vector<8x8xf32>
      %28 = arith.select %26, %27, %5 : vector<8x8xi1>, vector<8x8xf32>
      %c0_12 = arith.constant 0 : index
      %c0_13 = arith.constant 0 : index
      %29 = vector.load %arg5[%c0_12, %c0_13] : memref<8x1xf32, #tpu.memory_space<vmem>>, vector<8x1xf32>
      %cst_14 = arith.constant dense<0xFF800000> : vector<8xf32>
      %30 = vector.multi_reduction <maximumf>, %28, %cst_14 [1] : vector<8x8xf32> to vector<8xf32>
      %31 = vector.shape_cast %30 : vector<8xf32> to vector<8x1xf32>
      %32 = arith.maximumf %29, %31 : vector<8x1xf32>
      %c0_15 = arith.constant 0 : index
      %c0_16 = arith.constant 0 : index
      %33 = vector.load %arg6[%c0_15, %c0_16] : memref<8x1xf32, #tpu.memory_space<vmem>>, vector<8x1xf32>
      %34 = arith.subf %29, %32 : vector<8x1xf32>
      %35 = math.exp %34 : vector<8x1xf32>
      %36 = arith.mulf %33, %35 : vector<8x1xf32>
      %37 = vector.broadcast %32 : vector<8x1xf32> to vector<8x8xf32>
      %38 = arith.subf %28, %37 : vector<8x8xf32>
      %39 = math.exp %38 : vector<8x8xf32>
      %cst_17 = arith.constant dense<0.000000e+00> : vector<8xf32>
      %40 = vector.multi_reduction <add>, %39, %cst_17 [1] : vector<8x8xf32> to vector<8xf32>
      %41 = vector.shape_cast %40 : vector<8xf32> to vector<8x1xf32>
      %42 = arith.addf %36, %41 : vector<8x1xf32>
      %c0_18 = arith.constant 0 : index
      %c0_19 = arith.constant 0 : index
      %43 = vector.load %arg6[%c0_18, %c0_19] : memref<8x1xf32, #tpu.memory_space<vmem>>, vector<8x1xf32>
      tpu.vector_store %arg6[%c0_18, %c0_19], %42 {strides = array<i32>} : memref<8x1xf32, #tpu.memory_space<vmem>>, vector<8x1xf32>,
      %c0_20 = arith.constant 0 : index
      %c0_21 = arith.constant 0 : index
      %44 = vector.load %arg5[%c0_20, %c0_21] : memref<8x1xf32, #tpu.memory_space<vmem>>, vector<8x1xf32>
      tpu.vector_store %arg5[%c0_20, %c0_21], %32 {strides = array<i32>} : memref<8x1xf32, #tpu.memory_space<vmem>>, vector<8x1xf32>,
    } else {
    }
    %true = arith.constant true
    %15 = arith.xori %12, %true : i1
    %16 = arith.extui %15 : i1 to i32
    %c0_i32_8 = arith.constant 0 : i32
    %17 = arith.cmpi ne, %16, %c0_i32_8 : i32
    scf.if %17 {
      %c0_11 = arith.constant 0 : index
      %c0_12 = arith.constant 0 : index
      %21 = vector.load %arg5[%c0_11, %c0_12] : memref<8x1xf32, #tpu.memory_space<vmem>>, vector<8x1xf32>
      %cst_13 = arith.constant dense<0xFF800000> : vector<8xf32>
      %22 = vector.multi_reduction <maximumf>, %5, %cst_13 [1] : vector<8x8xf32> to vector<8xf32>
      %23 = vector.shape_cast %22 : vector<8xf32> to vector<8x1xf32>
      %24 = arith.maximumf %21, %23 : vector<8x1xf32>
      %c0_14 = arith.constant 0 : index
      %c0_15 = arith.constant 0 : index
      %25 = vector.load %arg6[%c0_14, %c0_15] : memref<8x1xf32, #tpu.memory_space<vmem>>, vector<8x1xf32>
      %26 = arith.subf %21, %24 : vector<8x1xf32>
      %27 = math.exp %26 : vector<8x1xf32>
      %28 = arith.mulf %25, %27 : vector<8x1xf32>
      %29 = vector.broadcast %24 : vector<8x1xf32> to vector<8x8xf32>
      %30 = arith.subf %5, %29 : vector<8x8xf32>
      %31 = math.exp %30 : vector<8x8xf32>
      %cst_16 = arith.constant dense<0.000000e+00> : vector<8xf32>
      %32 = vector.multi_reduction <add>, %31, %cst_16 [1] : vector<8x8xf32> to vector<8xf32>
      %33 = vector.shape_cast %32 : vector<8xf32> to vector<8x1xf32>
      %34 = arith.addf %28, %33 : vector<8x1xf32>
      %c0_17 = arith.constant 0 : index
      %c0_18 = arith.constant 0 : index
      %35 = vector.load %arg6[%c0_17, %c0_18] : memref<8x1xf32, #tpu.memory_space<vmem>>, vector<8x1xf32>
      tpu.vector_store %arg6[%c0_17, %c0_18], %34 {strides = array<i32>} : memref<8x1xf32, #tpu.memory_space<vmem>>, vector<8x1xf32>,
      %c0_19 = arith.constant 0 : index
      %c0_20 = arith.constant 0 : index
      %36 = vector.load %arg5[%c0_19, %c0_20] : memref<8x1xf32, #tpu.memory_space<vmem>>, vector<8x1xf32>
      tpu.vector_store %arg5[%c0_19, %c0_20], %24 {strides = array<i32>} : memref<8x1xf32, #tpu.memory_space<vmem>>, vector<8x1xf32>,
    } else {
    }
    %c0_i32_9 = arith.constant 0 : i32
    %18 = arith.cmpi eq, %arg1, %c0_i32_9 : i32
    %19 = arith.extui %18 : i1 to i32
    %c0_i32_10 = arith.constant 0 : i32
    %20 = arith.cmpi ne, %19, %c0_i32_10 : i32
    scf.if %20 {
      %c0_11 = arith.constant 0 : index
      %c0_12 = arith.constant 0 : index
      %21 = vector.load %arg5[%c0_11, %c0_12] : memref<8x1xf32, #tpu.memory_space<vmem>>, vector<8x1xf32>
      %c0_13 = arith.constant 0 : index
      %c0_14 = arith.constant 0 : index
      %22 = vector.load %arg6[%c0_13, %c0_14] : memref<8x1xf32, #tpu.memory_space<vmem>>, vector<8x1xf32>
      %23 = math.log %22 : vector<8x1xf32>
      %24 = arith.addf %21, %23 : vector<8x1xf32>
      %c0_15 = arith.constant 0 : index
      %c0_16 = arith.constant 0 : index
      %25 = vector.load %arg4[%c0_15, %c0_16] : memref<8x1xf32, #tpu.memory_space<vmem>>, vector<8x1xf32>
      tpu.vector_store %arg4[%c0_15, %c0_16], %24 {strides = array<i32>} : memref<8x1xf32, #tpu.memory_space<vmem>>, vector<8x1xf32>,
    } else {
    }
    return
  }
  func.func @transform_0(%arg0: i32, %arg1: i32) -> (i32, i32) {
    %c0_i32 = arith.constant 0 : i32
    %c0_i32_0 = arith.constant 0 : i32
    return %arg0, %c0_i32 : i32, i32
  }
  func.func @transform_1(%arg0: i32, %arg1: i32) -> (i32, i32) {
    %c0_i32 = arith.constant 0 : i32
    %c0_i32_0 = arith.constant 0 : i32
    return %arg1, %c0_i32 : i32, i32
  }
  func.func @transform_2(%arg0: i32, %arg1: i32) -> (i32, i32) {
    %c0_i32 = arith.constant 0 : i32
    %c0_i32_0 = arith.constant 0 : i32
    return %arg0, %c0_i32 : i32, i32
  }
}

</mosaic_0001>

<bundles_post_ra>
// kernel: tpu_custom_call.1
= control target key start
LH: loop header
LB: loop body
LE: loop exit
PB: predicated region body
PF: predicated region fallthrough
CT: control target
= control target key end

     0   :  { %7 = vsyncpa [#allocation5], 0  ;;  %s267_s0 = inlined_call_operand.hbm [shape: f32[8,32], index: 0, kind: input, shape index: {}]   ;;  %s268_s1 = inlined_call_operand.hbm [shape: f32[8,32], index: 1, kind: input, shape index: {}]   ;;  %s269_s2 = inlined_call_operand.vmem [shape: f32[8,1], index: 2, kind: output, shape index: {}]  }
   0x1   :  { %s14_s11 = sshll.u32 %s267_s0, 4  ;;  %s15_s11 = int_to_ptr.hbm [resolvable:$true] %s14_s11 }
   0x2   :  { %8 = vsyncpa [#allocation7], 0  ;;  %s231_s12 = smov [#allocation4]   ;;  %s25_s16 = sshll.u32 %s268_s1, 4  ;;  %s26_s16 = int_to_ptr.hbm [resolvable:$true] %s25_s16 }
   0x3   :  { %s16_s13 = sshll.u32 %s231_s12, 4  ;;  %s232_s17 = smov [#allocation6]   ;;  %s17_s13 = int_to_ptr.vmem [resolvable:$true] %s16_s13 }
   0x4   :  { %19 = dma.hbm_to_vmem [thread:$0]  %s15_s11, 128, %s17_s13, [#allocation5]  }
   0x5   :  { %s27_s18 = sshll.u32 %s232_s17, 4  ;;  %s28_s18 = int_to_ptr.vmem [resolvable:$true] %s27_s18 }
   0x6   :  { %30 = dma.hbm_to_vmem [thread:$0]  %s26_s16, 128, %s28_s18, [#allocation7]  }
   0x7   :  { %227 = dma.done.wait [#allocation5], 128  }
   0x8   :  { %228 = vsyncadd [#allocation5], 4294967168 }
   0x9   :  { %229 = dma.done.wait [#allocation7], 128  }
   0xa   :  { %230 = vsyncadd [#allocation7], 4294967168  ;;  %vm48_vm0 = vcmask 261120   ;;  %v47_v0 = vld [vmem:[#allocation6] sm:$0xff]  ;;  %v46_v1 = vld [vmem:[#allocation4] sm:$0xff]  ;;  %vm43_vm1 = vcmask 7168   ;;  %v85_v3 = vlaneseq }
   0xb   :  { %165 = vmatpush.xpose.msk.msra.mxu0 %vm48_vm0, %v47_v0  ;;  %v233_v2 = vmov -1e+30   ;;  %vm95_vm3 = vcmask 64512   ;;  %v234_v10 = vmov 0   ;;  %v235_v11 = vmov 0.0  }
   0xc   :  { %44 = vst.msk [vmem:[#allocation2] sm:$0xff] %vm43_vm1, %v233_v2  ;;  %v86_v4 = vand.u32 127, %v85_v3  ;;  %v88_v5 = vshrl.u32 %v85_v3, 7  ;;  %172 = vset.pattern.permute.xlu0 %v234_v10 }
   0xd   :  { %45 = vst.msk [vmem:[#allocation3] sm:$0xff] %vm43_vm1, %v235_v11 }
   0xe   :  { %166 = vmatmul.msk.f32.vlgmr.msra.gmra.mxu0 %vm48_vm0, %v46_v1  ;;  %v89_v6 = vsub.s32 %v86_v4, %v88_v5 }
  0x10   :  { %vm92_vm2 = vcmp.eq.s32.totalorder %v89_v6, 0 }
  0x13   :  { %v94_v12 = vld [vmem:[#allocation2] sm:$0xff] }
  0x14   :  { %v100_v23 = vld [vmem:[#allocation3] sm:$0xff] }
  0x8b   :  { %v72_v7 = vpop.f32.mrf.mxu0 }
  0x8c   :  { %v93_v8 = vsel %vm92_vm2, -1e+30, %v72_v7 }
  0x8d   :  { %v96_v9 = vsel %vm95_vm3, %v93_v8, -inf }
  0x8e   :  { %97 = vmax.xlane.f32.xlu0 %v96_v9 }
 0x101   :  { %v98_v13 = vpop.xlane.xlu0 %97 }
 0x102   :  { %v99_v14 = vmax.f32 %v94_v12, %v98_v13 }
 0x104   :  { %v101_v15 = vsub.f32 %v94_v12, %v99_v14  ;;  %119 = vst.msk [vmem:[#allocation2] sm:$0xff] %vm43_vm1, %v99_v14  ;;  %107 = vperm.xlu0 %172, %v99_v14  }
 0x106   :  { %v102_v21 = vmul.f32 1.442695, %v101_v15 }
 0x10b   :  { %v152_v30 = vld [vmem:[#allocation2] sm:$0xff] }
 0x176   :  { %v108_v16 = vpop.permute.xlu0 %107 }
 0x177   :  { %v110_v17 = vsub.f32 %v93_v8, %v108_v16 }
 0x179   :  { %v111_v18 = vmul.f32 1.442695, %v110_v17 }
 0x17b   :  { %173 = vpow2.f32 %v111_v18 }
 0x17c   :  { %175 = vpow2.f32 %v102_v21 }
 0x181   :  { %v174_v19 = vpop.eup %173 }
 0x182   :  { %v113_v20 = vsel %vm95_vm3, %v174_v19, 0.0  ;;  %v176_v22 = vpop.eup %175 }
 0x183   :  { %114 = vadd.xlane.f32.xlu1 %v113_v20  ;;  %v104_v24 = vmul.f32 %v176_v22, %v100_v23 }
 0x1f6   :  { %v115_v25 = vpop.xlane.xlu1 %114 }
 0x1f7   :  { %v116_v26 = vadd.f32 %v115_v25, %v104_v24 }
 0x1f9   :  { %118 = vst.msk [vmem:[#allocation3] sm:$0xff] %vm43_vm1, %v116_v26 }
 0x200   :  { %v153_v27 = vld [vmem:[#allocation3] sm:$0xff] }
 0x201   :  { %177 = vlog2.f32 %v153_v27 }
 0x207   :  { %v178_v28 = vpop.eup %177 }
 0x208   :  { %v155_v29 = vmul.f32 0.6931472, %v178_v28 }
 0x20a   :  { %v156_v31 = vadd.f32 %v155_v29, %v152_v30 }
 0x20c   :  { %158 = vst.msk [vmem:[%s269_s2] sm:$0xff] %vm43_vm1, %v156_v31 }
 0x20d   :  { %163 = vsyncpa [#allocation5], 1 }
 0x20e   :  { %164 = vsyncpa [#allocation7], 1 }

</bundles_post_ra>
